<compile_context>
chip_gen: v5e
topology: v5e:2x2
jax: 0.10.0
libtpu: 0.0.40
codegen_flags: <defaults>
</compile_context>

<pallas_src>
import math

import jax
import jax.numpy as jnp
from jax import lax
from jax.experimental import pallas as pl
from jax.experimental.pallas import tpu as pltpu


def weightnet_kernel(x_ref, w1_ref, w2_ref, out_ref):
    """Lane-dense 2-D tiles.

    x_ref  : (BB, L)   L = g*F*E, batch on sublanes, grouped fields on lanes
    w1_ref : (L, g*R)  kron(I_g, pool @ W1)   -> h = relu(x @ w1)
    w2_ref : (g*R, L)  kron(I_g, W2 @ expand) -> a = relu(h @ w2) (already
                       broadcast over the embedding dim)
    out_ref: (BB, L)
    """
    hi = lax.Precision.HIGHEST  # tiny matmuls, fully hidden under the DMA
    x = x_ref[...]
    h = jnp.maximum(
        jnp.dot(x, w1_ref[...], preferred_element_type=jnp.float32, precision=hi), 0.0)
    a = jnp.maximum(
        jnp.dot(h, w2_ref[...], preferred_element_type=jnp.float32, precision=hi), 0.0)
    out_ref[...] = (x * a).astype(out_ref.dtype)


def _padded_vmem_bytes(shape, itemsize):
    """(8,128)-padding-aware VMEM footprint of a 2-D constant."""
    r = max(8, -(-shape[0] // 8) * 8)
    c = max(128, -(-shape[1] // 128) * 128)
    return r * c * itemsize


def weight_network(x, w1, w2, *, batch_block=None, target_block_bytes=None):
    """x: (B, F, E) f32; w1: (F, R); w2: (R, F) (already y = z @ w layout)."""
    B, F, E = x.shape
    Fw, R = w1.shape
    assert Fw == F and w2.shape == (R, F)
    FE = F * E
    itemsize = jnp.dtype(x.dtype).itemsize

    # ---- lane-density fold: group g batch rows so the streamed lane axis is a
    #      multiple of 128 (unmasked stores, full vreg occupancy). -------------
    g = 128 // math.gcd(FE, 128)
    if g > 1 and B % g != 0:
        g = 1  # awkward batch size: fall back (lane dim = FE, still full-extent)
    rows = B // g
    lanes = g * FE
    x2 = x.reshape(rows, lanes)

    # ---- fold mean-pool + broadcast-expand into the excitation weights. ------
    # pool (FE,F): block-diag 1/E ; expand (F,FE): block-diag 0/1.  Exact fold.
    eye_f = jnp.eye(F, dtype=jnp.float32)
    pool = jnp.repeat(eye_f, E, axis=0) * (1.0 / E)          # (FE, F)
    expand = jnp.repeat(eye_f, E, axis=1)                    # (F, FE)
    w1p = pool @ w1.astype(jnp.float32)                      # (FE, R)
    w2p = w2.astype(jnp.float32) @ expand                    # (R, FE)
    if g > 1:
        eye_g = jnp.eye(g, dtype=jnp.float32)
        w1p = jnp.kron(eye_g, w1p)                           # (g*FE, g*R)
        w2p = jnp.kron(eye_g, w2p)                           # (g*R, g*FE)
    w1p = w1p.astype(x.dtype)
    w2p = w2p.astype(x.dtype)

    # ---- generation-aware block / VMEM sizing ---------------------------------
    vmem_cap = 128 << 20
    try:
        vmem_cap = int(pltpu.get_tpu_info().vmem_capacity_bytes)
    except Exception:
        pass
    if target_block_bytes is None:
        # v7x: 64 MiB VMEM but 3.2 TB/s -> 4 MiB blocks; v5e/v6e: 128 MiB -> 12 MiB.
        target_block_bytes = (4 << 20) if vmem_cap <= (64 << 20) else (12 << 20)

    row_bytes = lanes * itemsize
    if batch_block is None:
        if rows <= 8:
            batch_block = rows                       # single full-extent tile
        else:
            bb = max(8, (target_block_bytes // row_bytes) // 8 * 8)
            # keep >= ~8 grid steps when possible: pipelining + both v7x TCs.
            min_steps = 8
            cap = max(8, (rows // min_steps) // 8 * 8)
            batch_block = int(min(bb, cap, rows))
    grid = (pl.cdiv(rows, batch_block),)             # ragged tail rows masked

    block_bytes = batch_block * lanes * itemsize
    weight_bytes = (_padded_vmem_bytes(w1p.shape, itemsize)
                    + _padded_vmem_bytes(w2p.shape, itemsize))
    vmem_needed = 4 * block_bytes + 2 * weight_bytes + (2 << 20)
    vmem_ceiling = min(max(vmem_cap - (16 << 20), 32 << 20), 96 << 20)
    vmem_limit = int(min(max(vmem_needed, 16 << 20), vmem_ceiling))

    flops = 2 * B * (FE * R + R * FE) + B * FE
    bytes_accessed = 2 * B * FE * itemsize + 2 * weight_bytes

    out2 = pl.pallas_call(
        weightnet_kernel,
        out_shape=jax.ShapeDtypeStruct((rows, lanes), x.dtype),
        grid_spec=pltpu.PrefetchScalarGridSpec(
            num_scalar_prefetch=0,
            grid=grid,
            in_specs=[
                pl.BlockSpec((batch_block, lanes), lambda i: (i, 0)),
                # Weights: constant block index -> resident in VMEM, no re-fetch.
                pl.BlockSpec(w1p.shape, lambda i: (0, 0)),
                pl.BlockSpec(w2p.shape, lambda i: (0, 0)),
            ],
            out_specs=pl.BlockSpec((batch_block, lanes), lambda i: (i, 0)),
        ),
        compiler_params=pltpu.CompilerParams(
            dimension_semantics=("parallel",),       # lets v7x shard over 2 TCs
            vmem_limit_bytes=vmem_limit,
        ),
        cost_estimate=pl.CostEstimate(
            flops=int(flops), transcendentals=0, bytes_accessed=int(bytes_accessed)),
    )(x2, w1p, w2p)

    return out2.reshape(B, F, E)


def weight_network_ref(x, w1, w2):
    hi = lax.Precision.HIGHEST
    z = jnp.mean(x, axis=-1)
    h = jnp.maximum(jnp.matmul(z, w1, precision=hi), 0.0)
    a = jnp.maximum(jnp.matmul(h, w2, precision=hi), 0.0)
    return x * a[:, :, None]


if __name__ == "__main__":
    key = jax.random.PRNGKey(0)
    F, E = 6, 16                        # field_size, embed_dim
    reduction_ratio = 3
    R = max(1, F // reduction_ratio)    # reduction_size = 2

    kx, k1, k2, kx2 = jax.random.split(key, 4)
    # Parameters stored already-transposed w.r.t. torch (y = z @ w).
    w1 = jax.random.normal(k1, (F, R), dtype=jnp.float32) * 0.1
    w2 = jax.random.normal(k2, (R, F), dtype=jnp.float32) * 0.1

    # Case 1: batch divisible by the lane-fold group (g=4) -> 384-lane blocks,
    # multi-step pipelined grid (batch_block=8 rows of the folded view).
    B1 = 128
    x1 = jax.random.normal(kx, (B1, F, E), dtype=jnp.float32)
    out1 = jax.block_until_ready(weight_network(x1, w1, w2, batch_block=8))
    ref1 = weight_network_ref(x1, w1, w2)
    assert out1.shape == (B1, F, E)
    assert jnp.allclose(out1, ref1, atol=1e-4, rtol=1e-4), float(
        jnp.max(jnp.abs(out1 - ref1)))

    # Case 2: batch not divisible by g -> g=1 fallback + ragged tail block.
    B2 = 30
    x2 = jax.random.normal(kx2, (B2, F, E), dtype=jnp.float32)
    out2 = jax.block_until_ready(weight_network(x2, w1, w2))
    ref2 = weight_network_ref(x2, w1, w2)
    assert out2.shape == (B2, F, E)
    assert jnp.allclose(out2, ref2, atol=1e-4, rtol=1e-4), float(
        jnp.max(jnp.abs(out2 - ref2)))

    print("KERNEL_OK")
</pallas_src>

<mosaic_0001>
module attributes {stable_mosaic.version = 11 : i64} {
  func.func @weightnet_kernel(%arg0: i32, %arg1: memref<8x384xf32, #tpu.memory_space<vmem>>, %arg2: memref<384x8xf32, #tpu.memory_space<vmem>>, %arg3: memref<8x384xf32, #tpu.memory_space<vmem>>, %arg4: memref<8x384xf32, #tpu.memory_space<vmem>>) attributes {dimension_semantics = [#tpu.dimension_semantics<parallel>], iteration_bounds = array<i64: 4>, scalar_prefetch = 0 : i64, scratch_operands = 0 : i64, tpu.core_type = #tpu.core_type<tc>, window_params = [{transform_indices = @transform_0, window_bounds = array<i64: 8, 384>}, {pipeline_mode = #tpu.pipeline_mode<synchronous>, transform_indices = @transform_1, window_bounds = array<i64: 384, 8>}, {pipeline_mode = #tpu.pipeline_mode<synchronous>, transform_indices = @transform_2, window_bounds = array<i64: 8, 384>}, {transform_indices = @transform_3, window_bounds = array<i64: 8, 384>}]} {
    %c0 = arith.constant 0 : index
    %c0_0 = arith.constant 0 : index
    %0 = vector.load %arg1[%c0, %c0_0] : memref<8x384xf32, #tpu.memory_space<vmem>>, vector<8x384xf32>
    %c0_1 = arith.constant 0 : index
    %c0_2 = arith.constant 0 : index
    %1 = vector.load %arg2[%c0_1, %c0_2] : memref<384x8xf32, #tpu.memory_space<vmem>>, vector<384x8xf32>
    %cst = arith.constant dense<0.000000e+00> : vector<8x8xf32>
    %2 = tpu.matmul %0, %1, %cst {dimension_numbers = #tpu.dot_dimension_numbers<[1], [0], [0], [1], [0, 0, 1, 1], [], []>, precision = #tpu.contract_precision<fp32>} : vector<8x384xf32>, vector<384x8xf32>, vector<8x8xf32> -> vector<8x8xf32>
    %cst_3 = arith.constant 0.000000e+00 : f32
    %3 = vector.broadcast %cst_3 : f32 to vector<8x8xf32>
    %4 = arith.maximumf %2, %3 : vector<8x8xf32>
    %c0_4 = arith.constant 0 : index
    %c0_5 = arith.constant 0 : index
    %5 = vector.load %arg3[%c0_4, %c0_5] : memref<8x384xf32, #tpu.memory_space<vmem>>, vector<8x384xf32>
    %cst_6 = arith.constant dense<0.000000e+00> : vector<8x384xf32>
    %6 = tpu.matmul %4, %5, %cst_6 {dimension_numbers = #tpu.dot_dimension_numbers<[1], [0], [0], [1], [0, 0, 1, 1], [], []>, precision = #tpu.contract_precision<fp32>} : vector<8x8xf32>, vector<8x384xf32>, vector<8x384xf32> -> vector<8x384xf32>
    %cst_7 = arith.constant 0.000000e+00 : f32
    %7 = vector.broadcast %cst_7 : f32 to vector<8x384xf32>
    %8 = arith.maximumf %6, %7 : vector<8x384xf32>
    %9 = arith.mulf %0, %8 : vector<8x384xf32>
    %c0_8 = arith.constant 0 : index
    %c0_9 = arith.constant 0 : index
    %10 = vector.load %arg4[%c0_8, %c0_9] : memref<8x384xf32, #tpu.memory_space<vmem>>, vector<8x384xf32>
    tpu.vector_store %arg4[%c0_8, %c0_9], %9 {strides = array<i32>} : memref<8x384xf32, #tpu.memory_space<vmem>>, vector<8x384xf32>,
    return
  }
  func.func @transform_0(%arg0: i32) -> (i32, i32) {
    %c0_i32 = arith.constant 0 : i32
    %c0_i32_0 = arith.constant 0 : i32
    return %arg0, %c0_i32 : i32, i32
  }
  func.func @transform_1(%arg0: i32) -> (i32, i32) {
    %c0_i32 = arith.constant 0 : i32
    %c0_i32_0 = arith.constant 0 : i32
    %c0_i32_1 = arith.constant 0 : i32
    return %c0_i32, %c0_i32_0 : i32, i32
  }
  func.func @transform_2(%arg0: i32) -> (i32, i32) {
    %c0_i32 = arith.constant 0 : i32
    %c0_i32_0 = arith.constant 0 : i32
    %c0_i32_1 = arith.constant 0 : i32
    return %c0_i32, %c0_i32_0 : i32, i32
  }
  func.func @transform_3(%arg0: i32) -> (i32, i32) {
    %c0_i32 = arith.constant 0 : i32
    %c0_i32_0 = arith.constant 0 : i32
    return %arg0, %c0_i32 : i32, i32
  }
}

</mosaic_0001>

<bundles_post_ra>
// kernel: tpu_custom_call.1
= control target key start
LH: loop header
LB: loop body
LE: loop exit
PB: predicated region body
PF: predicated region fallthrough
CT: control target
= control target key end

     0   :  { %8 = vsyncpa [#allocation3], 0  ;;  %s2935_s0 = inlined_call_operand.vmem [shape: f32[32,384], index: 0, kind: input, shape index: {}]   ;;  %s2936_s1 = inlined_call_operand.vmem [shape: f32[384,8], index: 1, kind: input, shape index: {}]   ;;  %s2937_s2 = inlined_call_operand.vmem [shape: f32[8,384], index: 2, kind: input, shape index: {}]   ;;  %s2938_s3 = inlined_call_operand.hbm [shape: f32[32,384], index: 3, kind: output, shape index: {}]  }
   0x1   :  { %10 = vsyncpa [#allocation3 + $0x1], 0  ;;  %s1908_s12 = smov 0   ;;  %s1910_s13 = smov 0  }
   0x2   :  { %s1912_s14 = smov 0   ;;  %s1914_s15 = smov 0  }
   0x3 LB: > { %s1929_s16 = sadd.s32 4294967295, %s1886_s15   ;;  %s1774_s17 = sadd.s32 4294967294, %s1886_s15   ;;  %s1886_s15 = sphi %s1914_s15, %s3000_s15   ;;  %s1882_s14 = sphi %s1912_s14, %s2999_s14   ;;  %s1878_s13 = sphi %s1910_s13, %s2998_s13   ;;  %s1874_s12 = sphi %s1908_s12, %s2997_s12  }
   0x4   : > { %s1933_s18 = sadd.s32 1, %s1886_s15   ;;  %s91_s19 = sadd.s32 1, %s1882_s14 }
   0x5   : > { %s88_s20 = ssub.s32 %s1886_s15, %s1933_s18  ;;  %p101_p0 = scmp.ne.s32.totalorder %s1882_s14, %s1878_s13 }
   0x6   : > { %p89_p1 = scmp.eq.s32.totalorder %s88_s20, 0  ;;  %p102_p2 = scmp.eq.s32.totalorder %s1929_s16, 3 }
   0x7   : > { %p107_p3 = scmp.ne.s32.totalorder %s1878_s13, %s1874_s12  ;;  %p108_p4 = scmp.eq.s32.totalorder %s1774_s17, 3 }
   0x8   : > { %s1944_s21 = scalar_select %p89_p1, %s1882_s14, %s91_s19  }
   0x9   : > { %p1946_p5 = por %p102_p2, %p101_p0  ;;  %p1950_p6 = por %p108_p4, %p107_p3 }
   0xa   : > { %p1777_p7 = scmp.ge.s32.totalorder %s1886_s15, 1  ;;  %p140_p8 = scmp.lt.s32.totalorder %s1886_s15, 5 }
   0xc   : > { %p141_p9 = pnand %p1777_p7, %p140_p8 }
   0xe   : > { %144 = sbr.rel (%p141_p9) target bundleno = 523 (0x20b), region = 32 }
  0x13   : > { %v187_v0 = vld [vmem:[%s2936_s1 + $0x78] sm:$0xff]  ;;  %v186_v1 = vld [vmem:[%s2936_s1 + $0x70] sm:$0xff]  ;;  %v185_v2 = vld [vmem:[%s2936_s1 + $0x68] sm:$0xff]  ;;  %p164_p10 = scmp.lt.s32.totalorder %s1929_s16, 3  ;;  %vm1247_vm0 = vcmask 64512   ;;  %s161_s24 = sand.u32 1, %s1878_s13  }
  0x14   : > { %v1965_v3 = vand.u32 4294901760, %v187_v0  ;;  %v1967_v4 = vand.u32 4294901760, %v186_v1  ;;  %v1969_v5 = vand.u32 4294901760, %v185_v2  ;;  %v184_v6 = vld [vmem:[%s2936_s1 + $0x60] sm:$0xff]  ;;  %v183_v7 = vld [vmem:[%s2936_s1 + $0x58] sm:$0xff]  ;;  %v182_v8 = vld [vmem:[%s2936_s1 + $0x50] sm:$0xff] }
  0x15   : > { %v1980_v9 = vand.u32 4294901760, %v184_v6  ;;  %v1982_v10 = vand.u32 4294901760, %v183_v7  ;;  %v1984_v11 = vand.u32 4294901760, %v182_v8  ;;  %v181_v12 = vld [vmem:[%s2936_s1 + $0x48] sm:$0xff]  ;;  %v180_v13 = vld [vmem:[%s2936_s1 + $0x40] sm:$0xff]  ;;  %v179_v18 = vld [vmem:[%s2936_s1 + $0x38] sm:$0xff] }
  0x16   : > { %221 = vmatpush.msra.mxu0 %v1965_v3  ;;  %v1994_v14 = vsub.f32 %v187_v0, %v1965_v3  ;;  %v1997_v15 = vsub.f32 %v186_v1, %v1967_v4  ;;  %417 = vmatpush.msra.mxu3 %v1965_v3  ;;  %v2001_v16 = vsub.f32 %v185_v2, %v1969_v5  ;;  %v2003_v17 = vand.u32 4294901760, %v181_v12  ;;  %v178_v26 = vld [vmem:[%s2936_s1 + $0x30] sm:$0xff]  ;;  %v177_v34 = vld [vmem:[%s2936_s1 + $0x28] sm:$0xff]  ;;  %v176_v42 = vld [vmem:[%s2936_s1 + $0x20] sm:$0xff]  ;;  %s2250_s9 = scalar_select %p164_p10, %s1929_s16, 3 }
  0x17   : > { %v2009_v19 = vsub.f32 %v184_v6, %v1980_v9  ;;  %v2012_v20 = vsub.f32 %v183_v7, %v1982_v10  ;;  %v2015_v21 = vsub.f32 %v182_v8, %v1984_v11  ;;  %v2022_v25 = vand.u32 4294901760, %v180_v13  ;;  %v175_v48 = vld [vmem:[%s2936_s1 + $0x18] sm:$0xff]  ;;  %v174_v54 = vld [vmem:[%s2936_s1 + $0x10] sm:$0xff]  ;;  %v173_v61 = vld [vmem:[%s2936_s1 + $0x8] sm:$0xff]  ;;  %s1782_s25 = smul.u32 24, %s161_s24  ;;  %s1844_s10 = scalar_lea.hbm %s2938_s3, 96 }
  0x18   : > { %223 = vmatpush.msra.mxu0 %v1967_v4  ;;  %364 = vmatpush.msra.mxu2 %v1994_v14  ;;  %v263_v22 = vand.u32 4294901760, %v1994_v14  ;;  %v2954_v23 = vand.u32 4294901760, %v1997_v15  ;;  %v2952_v24 = vand.u32 4294901760, %v2001_v16  ;;  %v2029_v28 = vand.u32 4294901760, %v179_v18  ;;  %v203_v59 = vld [vmem:[%s2936_s1 + $0xf8] sm:$0xff]  ;;  %v172_v2 = vld [vmem:[%s2936_s1] sm:$0xff] }
  0x19   : > { %419 = vmatpush.msra.mxu3 %v1967_v4  ;;  %v2951_v27 = vand.u32 4294901760, %v2009_v19  ;;  %v2032_v29 = vsub.f32 %v181_v12, %v2003_v17  ;;  %v2948_v33 = vand.u32 4294901760, %v2012_v20  ;;  %v2050_v35 = vand.u32 4294901760, %v178_v26  ;;  %v202_v6 = vld [vmem:[%s2936_s1 + $0xf0] sm:$0xff]  ;;  %s1783_s20 = smul.u32 24, %s2250_s9  ;;  %s2894_s26 = scalar_lea.vmem [#allocation2], %s1782_s25 }
  0x1a   : > { %225 = vmatpush.msra.mxu0 %v1969_v5  ;;  %367 = vmatpush.msra.mxu2 %v1997_v15  ;;  %v264_v30 = vsub.f32 %v1994_v14, %v263_v22  ;;  %v270_v31 = vsub.f32 %v1997_v15, %v2954_v23  ;;  %v276_v32 = vsub.f32 %v2001_v16, %v2952_v24  ;;  %v2947_v36 = vand.u32 4294901760, %v2015_v21  ;;  %s1784_s27 = smul.u32 24, %s1929_s16  ;;  %s1712_s4 = sshll.u32 %s2894_s26, 4  ;;  %s1713_s4 = int_to_ptr.vmem [resolvable:$true] %s1712_s4 }
  0x1b   : > { %421 = vmatpush.msra.mxu3 %v1969_v5  ;;  %v282_v39 = vsub.f32 %v2009_v19, %v2951_v27  ;;  %v2059_v40 = vsub.f32 %v180_v13, %v2022_v25  ;;  %v2062_v41 = vand.u32 4294901760, %v177_v34  ;;  %v288_v44 = vsub.f32 %v2012_v20, %v2948_v33  ;;  %s2321_s30 = scalar_lea.vmem %s2935_s0, %s1783_s20  ;;  %s1699_s16 = scalar_lea.sflag [#allocation3], %s161_s24 }
  0x1c   : > { %227 = vmatpush.msra.mxu0 %v1980_v9  ;;  %v265_v37 = vand.u32 4294901760, %v264_v30  ;;  %370 = vmatpush.msra.mxu2 %v2001_v16  ;;  %v271_v38 = vand.u32 4294901760, %v270_v31  ;;  %v277_v43 = vand.u32 4294901760, %v276_v32  ;;  %v2945_v45 = vand.u32 4294901760, %v2032_v29  ;;  %v201_v32 = vld [vmem:[%s2936_s1 + $0xe8] sm:$0xff]  ;;  %s1710_s29 = scalar_lea.hbm %s2938_s3, %s1784_s27 }
  0x1d   : > { %423 = vmatpush.msra.mxu3 %v1980_v9  ;;  %v2073_v46 = vsub.f32 %v179_v18, %v2029_v28  ;;  %v294_v47 = vsub.f32 %v2015_v21, %v2947_v36  ;;  %v283_v49 = vand.u32 4294901760, %v282_v39  ;;  %v2084_v50 = vand.u32 4294901760, %v176_v42  ;;  %s1714_s5 = sshll.u32 %s1710_s29, 4  ;;  %s1715_s5 = int_to_ptr.hbm [resolvable:$true] %s1714_s5 }
  0x1e   : > { %229 = vmatpush.msra.mxu0 %v1982_v10  ;;  %266 = vmatpush.msra.mxu1 %v265_v37  ;;  %v2944_v51 = vand.u32 4294901760, %v2059_v40  ;;  %v2088_v52 = vsub.f32 %v178_v26, %v2050_v35  ;;  %v2093_v53 = vsub.f32 %v177_v34, %v2062_v41  ;;  %v289_v55 = vand.u32 4294901760, %v288_v44  ;;  %v200_v44 = vld [vmem:[%s2936_s1 + $0xe0] sm:$0xff]  ;;  %s1838_s6 = sshra.s32 %s1715_s5, 4  ;;  %s1839_s6 = int_to_ptr.hbm [resolvable:$true] %s1838_s6 }
  0x1f   : > { %373 = vmatpush.msra.mxu2 %v2009_v19  ;;  %425 = vmatpush.msra.mxu3 %v1982_v10  ;;  %v300_v56 = vsub.f32 %v2032_v29, %v2945_v45  ;;  %v2102_v57 = vand.u32 4294901760, %v175_v48  ;;  %v2943_v58 = vand.u32 4294901760, %v2073_v46  ;;  %v295_v60 = vand.u32 4294901760, %v294_v47  ;;  %v196_v45 = vld [vmem:[%s2936_s1 + $0xc0] sm:$0xff]  ;;  %s1840_s7 = scalar_lea.hbm %s1839_s6, 24  ;;  %p1845_p0 = scmp.lt.s32.totalorder %s1839_s6, %s2938_s3 }
  0x20   : > { %231 = vmatpush.msra.mxu0 %v1984_v11  ;;  %272 = vmatpush.msra.mxu1 %v271_v38  ;;  %v306_v62 = vsub.f32 %v2059_v40, %v2944_v51  ;;  %v2117_v63 = vand.u32 4294901760, %v174_v54  ;;  %v2942_v0 = vand.u32 4294901760, %v2088_v52  ;;  %v2121_v1 = vsub.f32 %v176_v42, %v2084_v50  ;;  %p1841_p11 = scmp.ne.s32.totalorder %s1839_s6, %s1840_s7  ;;  %p1846_p1 = scmp.lt.s32.totalorder %s1844_s10, %s1840_s7 }
  0x21   : > { %376 = vmatpush.msra.mxu2 %v2012_v20  ;;  %427 = vmatpush.msra.mxu3 %v1984_v11  ;;  %v2940_v7 = vand.u32 4294901760, %v2093_v53  ;;  %v2132_v8 = vand.u32 4294901760, %v203_v59  ;;  %v301_v12 = vand.u32 4294901760, %v300_v56  ;;  %v312_v13 = vsub.f32 %v2073_v46, %v2943_v58 }
  0x22   : > { %233 = vmatpush.msra.mxu0 %v2003_v17  ;;  %278 = vmatpush.msra.mxu1 %v277_v43  ;;  %v2138_v18 = vand.u32 4294901760, %v173_v61  ;;  %v2141_v26 = vsub.f32 %v175_v48, %v2102_v57  ;;  %v2145_v30 = vand.u32 4294901760, %v172_v2  ;;  %v2147_v31 = vand.u32 4294901760, %v202_v6  ;;  %p1842_p12 = pnand %p1841_p11, %p1946_p5  ;;  %p1847_p2 = por %p1846_p1, %p1845_p0 }
  0x23   : > { %379 = vmatpush.msra.mxu2 %v2015_v21  ;;  %429 = vmatpush.msra.mxu3 %v2003_v17  ;;  %v307_v34 = vand.u32 4294901760, %v306_v62  ;;  %v318_v37 = vsub.f32 %v2088_v52, %v2942_v0  ;;  %v2939_v38 = vand.u32 4294901760, %v2121_v1  ;;  %v2158_v39 = vsub.f32 %v174_v54, %v2117_v63 }
  0x24   : > { %235 = vmatpush.msra.mxu0 %v2022_v25  ;;  %284 = vmatpush.msra.mxu1 %v283_v49  ;;  %v324_v42 = vsub.f32 %v2093_v53, %v2940_v7  ;;  %v2166_v43 = vsub.f32 %v203_v59, %v2132_v8  ;;  %v313_v47 = vand.u32 4294901760, %v312_v13  ;;  %v2941_v48 = vand.u32 4294901760, %v2141_v26  ;;  %v199_v59 = vld [vmem:[%s2936_s1 + $0xd8] sm:$0xff]  ;;  %v198_v13 = vld [vmem:[%s2936_s1 + $0xd0] sm:$0xff]  ;;  %v197_v7 = vld [vmem:[%s2936_s1 + $0xc8] sm:$0xff]  ;;  %p1843_p13 = pneg %p1842_p12 }
  0x25   : > { %382 = vmatpush.msra.mxu2 %v2032_v29  ;;  %431 = vmatpush.msra.mxu3 %v2022_v25  ;;  %v2174_v49 = vsub.f32 %v173_v61, %v2138_v18  ;;  %v2176_v54 = vand.u32 4294901760, %v201_v32  ;;  %v2184_v56 = vsub.f32 %v202_v6, %v2147_v31  ;;  %v330_v61 = vsub.f32 %v2121_v1, %v2939_v38 }
  0x26   : > { %237 = vmatpush.msra.mxu0 %v2029_v28  ;;  %290 = vmatpush.msra.mxu1 %v289_v55  ;;  %v2181_v55 = vsub.f32 %v172_v2, %v2145_v30  ;;  %v2946_v62 = vand.u32 4294901760, %v2158_v39  ;;  %v2194_v2 = vand.u32 4294901760, %v200_v44  ;;  %v325_v6 = vand.u32 4294901760, %v324_v42  ;;  %p1848_p3 = pnand %p1847_p2, %p1843_p13 }
  0x27   : > { %385 = vmatpush.msra.mxu2 %v2059_v40  ;;  %433 = vmatpush.msra.mxu3 %v2029_v28  ;;  %2965 = vst [vmem:[#allocation5_spill] sm:$0xff] %v2176_v54  ;;  %v2208_v38 = vsub.f32 %v201_v32, %v2176_v54  ;;  %v2210_v42 = vand.u32 4294901760, %v199_v59  ;;  %v331_v32 = vand.u32 4294901760, %v330_v61  ;;  %v2227_v51 = vand.u32 4294901760, %v198_v13 }
  0x28   : > { %239 = vmatpush.msra.mxu0 %v2050_v35  ;;  %296 = vmatpush.msra.mxu1 %v295_v60  ;;  %v319_v60 = vand.u32 4294901760, %v318_v37  ;;  %v2950_v37 = vand.u32 4294901760, %v2174_v49  ;;  %v342_v0 = vsub.f32 %v2158_v39, %v2946_v62  ;;  %v2225_v58 = vsub.f32 %v200_v44, %v2194_v2 }
  0x29   : > { %388 = vmatpush.msra.mxu2 %v2073_v46  ;;  %435 = vmatpush.msra.mxu3 %v2050_v35  ;;  %v2237_v61 = vand.u32 4294901760, %v197_v7  ;;  %v2955_v36 = vand.u32 4294901760, %v2208_v38  ;;  %v2245_v33 = vsub.f32 %v199_v59, %v2210_v42  ;;  %v2268_v24 = vsub.f32 %v198_v13, %v2227_v51 }
  0x2a   : > { %241 = vmatpush.msra.mxu0 %v2062_v41  ;;  %302 = vmatpush.msra.mxu1 %v301_v12  ;;  %v2949_v12 = vand.u32 4294901760, %v2166_v43  ;;  %v348_v62 = vsub.f32 %v2174_v49, %v2950_v37  ;;  %v343_v59 = vand.u32 4294901760, %v342_v0  ;;  %v2957_v27 = vand.u32 4294901760, %v2225_v58  ;;  %v194_v0 = vld [vmem:[%s2936_s1 + $0xb0] sm:$0xff] }
  0x2b   : > { %391 = vmatpush.msra.mxu2 %v2088_v52  ;;  %437 = vmatpush.msra.mxu3 %v2062_v41  ;;  %v2274_v23 = vsub.f32 %v197_v7, %v2237_v61  ;;  %v617_v13 = vsub.f32 %v2208_v38, %v2955_v36  ;;  %v2958_v14 = vand.u32 4294901760, %v2245_v33  ;;  %v2966_v7 = vand.u32 4294901760, %v1997_v15 }
  0x2c   : > { %243 = vmatpush.msra.mxu0 %v2084_v50  ;;  %308 = vmatpush.msra.mxu1 %v307_v34  ;;  %v336_v34 = vsub.f32 %v2141_v26, %v2941_v48  ;;  %v2953_v48 = vand.u32 4294901760, %v2184_v56 }
  0x2d   : > { %394 = vmatpush.msra.mxu2 %v2093_v53  ;;  %439 = vmatpush.msra.mxu3 %v2084_v50 }
  0x2e   : > { %245 = vmatpush.msra.mxu0 %v2102_v57  ;;  %314 = vmatpush.msra.mxu1 %v313_v47  ;;  %v2956_v47 = vand.u32 4294901760, %v2181_v55  ;;  %v337_v44 = vand.u32 4294901760, %v336_v34  ;;  %v2257_v34 = vand.u32 4294901760, %v196_v45 }
  0x2f   : > { %397 = vmatpush.msra.mxu2 %v2121_v1  ;;  %441 = vmatpush.msra.mxu3 %v2102_v57 }
  0x30   : > { %247 = vmatpush.msra.mxu0 %v2117_v63  ;;  %320 = vmatpush.msra.mxu1 %v319_v60  ;;  %v605_v60 = vsub.f32 %v2166_v43, %v2949_v12  ;;  %v195_v12 = vld [vmem:[%s2936_s1 + $0xb8] sm:$0xff]  ;;  %v354_v37 = vsub.f32 %v2181_v55, %v2956_v47  ;;  %v623_v47 = vsub.f32 %v2225_v58, %v2957_v27 }
  0x31   : > { %400 = vmatpush.msra.mxu2 %v2141_v26  ;;  %443 = vmatpush.msra.mxu3 %v2117_v63  ;;  %v629_v27 = vsub.f32 %v2245_v33, %v2958_v14 }
  0x32   : > { %249 = vmatpush.msra.mxu0 %v2138_v18  ;;  %326 = vmatpush.msra.mxu1 %v325_v6  ;;  %v611_v6 = vsub.f32 %v2184_v56, %v2953_v48  ;;  %v606_v48 = vand.u32 4294901760, %v605_v60  ;;  %v355_v36 = vand.u32 4294901760, %v354_v37  ;;  %v618_v37 = vand.u32 4294901760, %v617_v13  ;;  %v191_v13 = vld [vmem:[%s2936_s1 + $0x98] sm:$0xff] }
  0x33   : > { %403 = vmatpush.msra.mxu2 %v2158_v39  ;;  %445 = vmatpush.msra.mxu3 %v2138_v18 }
  0x34   : > { %251 = vmatpush.msra.mxu0 %v2145_v30  ;;  %332 = vmatpush.msra.mxu1 %v331_v32  ;;  %v349_v32 = vand.u32 4294901760, %v348_v62  ;;  %v612_v60 = vand.u32 4294901760, %v611_v6  ;;  %v193_v62 = vld [vmem:[%s2936_s1 + $0xa8] sm:$0xff]  ;;  %v2967_v6 = vand.u32 4294901760, %v2001_v16 }
  0x35   : > { %406 = vmatpush.msra.mxu2 %v2174_v49  ;;  %447 = vmatpush.msra.mxu3 %v2145_v30  ;;  %v2316_v16 = vand.u32 4294901760, %v193_v62 }
  0x36   : > { %458 = vmatpush.msrb.mxu0 %v263_v22  ;;  %338 = vmatpush.msra.mxu1 %v337_v44  ;;  %v2284_v22 = vand.u32 4294901760, %v195_v12  ;;  %v2291_v44 = vsub.f32 %v196_v45, %v2257_v34 }
  0x37   : > { %409 = vmatpush.msra.mxu2 %v2181_v55  ;;  %607 = vmatpush.msrb.mxu3 %v606_v48  ;;  %v2968_v48 = vand.u32 4294901760, %v2009_v19 }
  0x38   : > { %462 = vmatpush.msrb.mxu0 %v2966_v7  ;;  %344 = vmatpush.msra.mxu1 %v343_v59  ;;  %v2301_v7 = vand.u32 4294901760, %v194_v0  ;;  %v192_v59 = vld [vmem:[%s2936_s1 + $0xa0] sm:$0xff]  ;;  %v2314_v15 = vsub.f32 %v195_v12, %v2284_v22  ;;  %v624_v12 = vand.u32 4294901760, %v623_v47  ;;  %v630_v47 = vand.u32 4294901760, %v629_v27  ;;  %v190_v27 = vld [vmem:[%s2936_s1 + $0x90] sm:$0xff] }
  0x39   : > { %562 = vmatpush.msrb.mxu2 %v2132_v8  ;;  %613 = vmatpush.msrb.mxu3 %v612_v60  ;;  %v2336_v19 = vand.u32 4294901760, %v192_v59  ;;  %v2970_v60 = vand.u32 4294901760, %v2012_v20  ;;  %v2972_v20 = vand.u32 4294901760, %v2015_v21 }
  0x3a   : > { %466 = vmatpush.msrb.mxu0 %v2967_v6  ;;  %350 = vmatpush.msra.mxu1 %v349_v32  ;;  %v2969_v6 = vand.u32 4294901760, %v2268_v24  ;;  %v2334_v45 = vsub.f32 %v194_v0, %v2301_v7  ;;  %v2345_v32 = vld [vmem:[%s2321_s30] sm:$0xff]  ;;  %v2961_v0 = vand.u32 4294901760, %v2314_v15 }
  0x3b   : > { %564 = vmatpush.msrb.mxu2 %v2147_v31  ;;  %619 = vmatpush.msrb.mxu3 %v618_v37  ;;  %v2369_v21 = vand.u32 4294901760, %v2345_v32 }
  0x3c   : > { %470 = vmatpush.msrb.mxu0 %v2968_v48  ;;  %356 = vmatpush.msra.mxu1 %v355_v36  ;;  %v635_v14 = vsub.f32 %v2268_v24, %v2969_v6  ;;  %v2971_v48 = vand.u32 4294901760, %v2274_v23  ;;  %v2350_v6 = vsub.f32 %v193_v62, %v2316_v16  ;;  %v2962_v37 = vand.u32 4294901760, %v2334_v45 }
  0x3d   : > { %566 = vmatpush.msrb.mxu2 %v2176_v54  ;;  %v2352_v54 = vand.u32 4294901760, %v191_v13  ;;  %625 = vmatpush.msrb.mxu3 %v624_v12  ;;  %v2382_v12 = vand.u32 4294901760, %v190_v27 }
  0x3e   : > { %474 = vmatpush.msrb.mxu0 %v2970_v60  ;;  %525 = vmatpush.msrb.mxu1 %v1965_v3  ;;  %v641_v36 = vsub.f32 %v2274_v23, %v2971_v48  ;;  %v2973_v3 = vand.u32 4294901760, %v2291_v44  ;;  %v636_v62 = vand.u32 4294901760, %v635_v14  ;;  %v2366_v48 = vsub.f32 %v192_v59, %v2336_v19 }
  0x3f   : > { %568 = vmatpush.msrb.mxu2 %v2194_v2  ;;  %631 = vmatpush.msrb.mxu3 %v630_v47  ;;  %v653_v14 = vsub.f32 %v2314_v15, %v2961_v0  ;;  %v664_v59 = vand.u32 4294901760, %v2350_v6  ;;  %v659_v47 = vsub.f32 %v2334_v45, %v2962_v37  ;;  %v2397_v0 = vsub.f32 %v2345_v32, %v2369_v21 }
  0x40   : > { %478 = vmatpush.msrb.mxu0 %v2972_v20  ;;  %527 = vmatpush.msrb.mxu1 %v1967_v4  ;;  %v647_v60 = vsub.f32 %v2291_v44, %v2973_v3  ;;  %v2974_v4 = vand.u32 4294901760, %v2032_v29  ;;  %v642_v20 = vand.u32 4294901760, %v641_v36  ;;  %v189_v3 = vld [vmem:[%s2936_s1 + $0x88] sm:$0xff]  ;;  %v2385_v29 = vsub.f32 %v191_v13, %v2352_v54 }
  0x41   : > { %570 = vmatpush.msrb.mxu2 %v2210_v42  ;;  %637 = vmatpush.msrb.mxu3 %v636_v62  ;;  %v2399_v13 = vand.u32 4294901760, %v189_v3  ;;  %v665_v62 = vsub.f32 %v2350_v6, %v664_v59  ;;  %v2413_v37 = vsub.f32 %v190_v27, %v2382_v12 }
  0x42   : > { %482 = vmatpush.msrb.mxu0 %v2974_v4  ;;  %529 = vmatpush.msrb.mxu1 %v1969_v5  ;;  %v2975_v5 = vand.u32 4294901760, %v2059_v40  ;;  %v648_v36 = vand.u32 4294901760, %v647_v60  ;;  %v2976_v40 = vand.u32 4294901760, %v2073_v46  ;;  %v654_v60 = vand.u32 4294901760, %v653_v14 }
  0x43   : > { %572 = vmatpush.msrb.mxu2 %v2227_v51  ;;  %643 = vmatpush.msrb.mxu3 %v642_v20  ;;  %v2977_v4 = vand.u32 4294901760, %v2088_v52  ;;  %v660_v46 = vand.u32 4294901760, %v659_v47  ;;  %v2978_v20 = vand.u32 4294901760, %v2366_v48  ;;  %v2426_v27 = vsub.f32 %v189_v3, %v2399_v13 }
  0x44   : > { %486 = vmatpush.msrb.mxu0 %v2975_v5  ;;  %531 = vmatpush.msrb.mxu1 %v1980_v9  ;;  %v188_v9 = vld [vmem:[%s2936_s1 + $0x80] sm:$0xff]  ;;  %v676_v5 = vand.u32 4294901760, %v2385_v29  ;;  %v2979_v52 = vand.u32 4294901760, %v2093_v53  ;;  %v2980_v3 = vand.u32 4294901760, %v2121_v1 }
  0x45   : > { %574 = vmatpush.msrb.mxu2 %v2237_v61  ;;  %649 = vmatpush.msrb.mxu3 %v648_v36  ;;  %v671_v14 = vsub.f32 %v2366_v48, %v2978_v20  ;;  %v666_v36 = vand.u32 4294901760, %v665_v62  ;;  %v688_v62 = vand.u32 4294901760, %v2426_v27 }
  0x46   : > { %490 = vmatpush.msrb.mxu0 %v2976_v40  ;;  %533 = vmatpush.msrb.mxu1 %v1982_v10  ;;  %v2418_v10 = vand.u32 4294901760, %v188_v9  ;;  %v254_v40 = vand.u32 4294901760, %v2397_v0  ;;  %v677_v47 = vsub.f32 %v2385_v29, %v676_v5 }
  0x47   : > { %576 = vmatpush.msrb.mxu2 %v2257_v34  ;;  %655 = vmatpush.msrb.mxu3 %v654_v60 }
  0x48   : > { %494 = vmatpush.msrb.mxu0 %v2977_v4  ;;  %535 = vmatpush.msrb.mxu1 %v1984_v11  ;;  %v2432_v11 = vld [vmem:[%s2321_s30 + $0x8] sm:$0xff]  ;;  %v682_v4 = vand.u32 4294901760, %v2413_v37  ;;  %v2443_v53 = vsub.f32 %v188_v9, %v2418_v10  ;;  %v255_v60 = vsub.f32 %v2397_v0, %v254_v40  ;;  %v2982_v9 = vand.u32 4294901760, %v2158_v39 }
  0x49   : > { %578 = vmatpush.msrb.mxu2 %v2284_v22  ;;  %661 = vmatpush.msrb.mxu3 %v660_v46  ;;  %v2449_v20 = vand.u32 4294901760, %v2432_v11  ;;  %v2984_v39 = vand.u32 4294901760, %v2181_v55 }
  0x4a   : > { %498 = vmatpush.msrb.mxu0 %v2979_v52  ;;  %537 = vmatpush.msrb.mxu1 %v2003_v17  ;;  %v672_v17 = vand.u32 4294901760, %v671_v14  ;;  %v2981_v52 = vand.u32 4294901760, %v2141_v26  ;;  %v683_v1 = vsub.f32 %v2413_v37, %v682_v4  ;;  %v694_v46 = vand.u32 4294901760, %v2443_v53 }
  0x4b   : > { %580 = vmatpush.msrb.mxu2 %v2301_v7  ;;  %667 = vmatpush.msrb.mxu3 %v666_v36  ;;  %v256_v26 = vand.u32 4294901760, %v255_v60  ;;  %v2468_v14 = vsub.f32 %v2432_v11, %v2449_v20  ;;  %v2983_v36 = vand.u32 4294901760, %v2174_v49 }
  0x4c   : > { %502 = vmatpush.msrb.mxu0 %v2980_v3  ;;  %539 = vmatpush.msrb.mxu1 %v2022_v25  ;;  %v678_v25 = vand.u32 4294901760, %v677_v47  ;;  %v695_v47 = vsub.f32 %v2443_v53, %v694_v46 }
  0x4d   : > { %582 = vmatpush.msrb.mxu2 %v2316_v16  ;;  %673 = vmatpush.msrb.mxu3 %v672_v17  ;;  %v595_v3 = vand.u32 4294901760, %v2468_v14 }
  0x4e   : > { %506 = vmatpush.msrb.mxu0 %v2981_v52  ;;  %541 = vmatpush.msrb.mxu1 %v2029_v28  ;;  %v689_v28 = vsub.f32 %v2426_v27, %v688_v62  ;;  %v210_v52 = vld [vmem:[%s2936_s1 + $0x130] sm:$0xff] }
  0x4f   : > { %584 = vmatpush.msrb.mxu2 %v2336_v19  ;;  %679 = vmatpush.msrb.mxu3 %v678_v25 }
  0x50   : > { %510 = vmatpush.msrb.mxu0 %v2982_v9  ;;  %543 = vmatpush.msrb.mxu1 %v2050_v35  ;;  %v684_v35 = vand.u32 4294901760, %v683_v1  ;;  %v690_v49 = vand.u32 4294901760, %v689_v28 }
  0x51   : > { %586 = vmatpush.msrb.mxu2 %v2352_v54  ;;  %257 = vmatmul.f32.vlgmr.msra.gmra.mxu0 %v256_v26 }
  0x52   : > { %514 = vmatpush.msrb.mxu0 %v2983_v36  ;;  %545 = vmatpush.msrb.mxu1 %v2062_v41  ;;  %v696_v41 = vand.u32 4294901760, %v695_v47  ;;  %v2676_v36 = vand.u32 4294901760, %v210_v52  ;;  %v2689_v47 = vld [vmem:[%s2321_s30 + $0x10] sm:$0xff] }
  0x53   : > { %588 = vmatpush.msrb.mxu2 %v2382_v12  ;;  %685 = vmatpush.msrb.mxu3 %v684_v35 }
  0x54   : > { %518 = vmatpush.msrb.mxu0 %v2984_v39  ;;  %547 = vmatpush.msrb.mxu1 %v2084_v50  ;;  %v596_v50 = vsub.f32 %v2468_v14, %v595_v3 }
  0x55   : > { %590 = vmatpush.msrb.mxu2 %v2399_v13  ;;  %691 = vmatpush.msrb.mxu3 %v690_v49 }
  0x56   : > { %705 = vmatpush.msra.mxu0 %v2166_v43  ;;  %549 = vmatpush.msrb.mxu1 %v2102_v57  ;;  %v2985_v57 = vand.u32 4294901760, %v2166_v43  ;;  %v597_v55 = vand.u32 4294901760, %v596_v50  ;;  %v2987_v43 = vand.u32 4294901760, %v2208_v38 }
  0x57   : > { %412 = vmatmul.f32.vlgmr.msra.gmra.mxu2 %v2397_v0  ;;  %451 = vmatmul.f32.vlgmr.msra.gmra.mxu3 %v254_v40  ;;  %v214_v0 = vld [vmem:[%s2936_s1 + $0x150] sm:$0xff] }
  0x58   : > { %708 = vmatpush.msra.mxu0 %v2184_v56  ;;  %551 = vmatpush.msrb.mxu1 %v2117_v63  ;;  %v2986_v63 = vand.u32 4294901760, %v2184_v56  ;;  %v2989_v56 = vld [vmem:[#allocation5_spill] sm:$0xff] }
  0x59   : > { %592 = vmatpush.msrb.mxu2 %v2418_v10  ;;  %697 = vmatpush.msrb.mxu3 %v696_v41 }
  0x5a   : > { %711 = vmatpush.msra.mxu0 %v2208_v38  ;;  %553 = vmatpush.msrb.mxu1 %v2138_v18  ;;  %v2988_v18 = vand.u32 4294901760, %v2225_v58 }
  0x5b   : > { %799 = vmatpush.msra.mxu2 %v2985_v57  ;;  %358 = vmatmul.f32.vlgmr.msra.gmra.mxu1 %v2369_v21  ;;  %v207_v57 = vld [vmem:[%s2936_s1 + $0x118] sm:$0xff] }
  0x5c   : > { %714 = vmatpush.msra.mxu0 %v2225_v58  ;;  %866 = vmatpush.msra.mxu3 %v2132_v8  ;;  %v2991_v58 = vand.u32 4294901760, %v2268_v24 }
  0x5d   : > { %803 = vmatpush.msra.mxu2 %v2986_v63  ;;  %555 = vmatpush.msrb.mxu1 %v2145_v30  ;;  %v2993_v30 = vand.u32 4294901760, %v2291_v44 }
  0x5e   : > { %717 = vmatpush.msra.mxu0 %v2245_v33  ;;  %868 = vmatpush.msra.mxu3 %v2147_v31 }
  0x5f   : > { %758 = vmatpush.msra.mxu1 %v2132_v8  ;;  %807 = vmatpush.msra.mxu2 %v2987_v43  ;;  %v2990_v8 = vand.u32 4294901760, %v2245_v33  ;;  %v2992_v33 = vand.u32 4294901760, %v2274_v23 }
  0x60   : > { %598 = vmatmul.f32.vlgmr.msrb.gmra.mxu2 %v597_v55  ;;  %720 = vmatpush.msra.mxu0 %v2268_v24  ;;  %v2994_v24 = vand.u32 4294901760, %v2314_v15 }
  0x61   : > { %760 = vmatpush.msra.mxu1 %v2147_v31  ;;  %811 = vmatpush.msra.mxu2 %v2988_v18  ;;  %v2995_v31 = vand.u32 4294901760, %v2334_v45  ;;  %v2713_v18 = vsub.f32 %v210_v52, %v2676_v36  ;;  %v204_v52 = vld [vmem:[%s2936_s1 + $0x100] sm:$0xff] }
  0x62   : > { %870 = vmatpush.msra.mxu3 %v2989_v56  ;;  %520 = vmatmul.f32.vlgmr.msrb.gmra.mxu0 %v2369_v21 }
  0x63   : > { %699 = vmatmul.f32.vlgmr.msrb.gmra.mxu3 %v2449_v20  ;;  %723 = vmatpush.msra.mxu0 %v2274_v23  ;;  %v219_v23 = vld [vmem:[%s2936_s1 + $0x178] sm:$0xff] }
  0x64   : > { %762 = vmatpush.msra.mxu1 %v2989_v56  ;;  %815 = vmatpush.msra.mxu2 %v2990_v8  ;;  %v2550_v38 = vand.u32 4294901760, %v219_v23  ;;  %v2716_v56 = vand.u32 4294901760, %v2689_v47 }
  0x65   : > { %872 = vmatpush.msra.mxu3 %v2194_v2  ;;  %557 = vmatmul.f32.vlgmr.msrb.gmra.mxu1 %v2369_v21  ;;  %v213_v21 = vld [vmem:[%s2936_s1 + $0x148] sm:$0xff] }
  0x66   : > { %726 = vmatpush.msra.mxu0 %v2291_v44  ;;  %764 = vmatpush.msra.mxu1 %v2194_v2  ;;  %v217_v2 = vld [vmem:[%s2936_s1 + $0x168] sm:$0xff]  ;;  %v2573_v44 = vsub.f32 %v219_v23, %v2550_v38 }
  0x67   : > { %819 = vmatpush.msra.mxu2 %v2991_v58  ;;  %874 = vmatpush.msra.mxu3 %v2210_v42  ;;  %v206_v58 = vld [vmem:[%s2936_s1 + $0x110] sm:$0xff] }
  0x68   : > { %729 = vmatpush.msra.mxu0 %v2314_v15  ;;  %766 = vmatpush.msra.mxu1 %v2210_v42  ;;  %v215_v15 = vld [vmem:[%s2936_s1 + $0x158] sm:$0xff] }
  0x69   : > { %823 = vmatpush.msra.mxu2 %v2992_v33  ;;  %876 = vmatpush.msra.mxu3 %v2227_v51 }
  0x6a   : > { %732 = vmatpush.msra.mxu0 %v2334_v45  ;;  %768 = vmatpush.msra.mxu1 %v2227_v51  ;;  %v218_v51 = vld [vmem:[%s2936_s1 + $0x170] sm:$0xff] }
  0x6b   : > { %827 = vmatpush.msra.mxu2 %v2993_v30  ;;  %878 = vmatpush.msra.mxu3 %v2237_v61  ;;  %v2560_v42 = vand.u32 4294901760, %v218_v51  ;;  %v2727_v30 = vand.u32 4294901760, %v207_v57 }
  0x6c   : > { %735 = vmatpush.msra.mxu0 %v2350_v6  ;;  %770 = vmatpush.msra.mxu1 %v2237_v61  ;;  %v216_v61 = vld [vmem:[%s2936_s1 + $0x160] sm:$0xff]  ;;  %v945_v6 = vand.u32 4294901760, %v2573_v44 }
  0x6d   : > { %831 = vmatpush.msra.mxu2 %v2994_v24  ;;  %880 = vmatpush.msra.mxu3 %v2257_v34  ;;  %v2586_v45 = vsub.f32 %v218_v51, %v2560_v42 }
  0x6e   : > { %738 = vmatpush.msra.mxu0 %v2366_v48  ;;  %772 = vmatpush.msra.mxu1 %v2257_v34  ;;  %v2996_v34 = vand.u32 4294901760, %v2366_v48 }
  0x6f   : > { %835 = vmatpush.msra.mxu2 %v2995_v31  ;;  %882 = vmatpush.msra.mxu3 %v2284_v22  ;;  %v205_v31 = vld [vmem:[%s2936_s1 + $0x108] sm:$0xff] }
  0x70   : > { %741 = vmatpush.msra.mxu0 %v2385_v29  ;;  %774 = vmatpush.msra.mxu1 %v2284_v22  ;;  %v2570_v22 = vand.u32 4294901760, %v217_v2  ;;  %v2618_v29 = vand.u32 4294901760, %v213_v21 }
  0x71   : > { %839 = vmatpush.msra.mxu2 %v664_v59  ;;  %884 = vmatpush.msra.mxu3 %v2301_v7 }
  0x72   : > { %744 = vmatpush.msra.mxu0 %v2413_v37  ;;  %776 = vmatpush.msra.mxu1 %v2301_v7  ;;  %v2583_v7 = vand.u32 4294901760, %v216_v61  ;;  %v2600_v48 = vsub.f32 %v217_v2, %v2570_v22  ;;  %v951_v37 = vand.u32 4294901760, %v2586_v45 }
  0x73   : > { %843 = vmatpush.msra.mxu2 %v2996_v34  ;;  %886 = vmatpush.msra.mxu3 %v2316_v16  ;;  %v999_v34 = vand.u32 4294901760, %v2713_v18 }
  0x74   : > { %747 = vmatpush.msra.mxu0 %v2426_v27  ;;  %778 = vmatpush.msra.mxu1 %v2316_v16  ;;  %v2596_v16 = vand.u32 4294901760, %v215_v15  ;;  %v2614_v59 = vsub.f32 %v216_v61, %v2583_v7  ;;  %v957_v40 = vand.u32 4294901760, %v2600_v48  ;;  %v2742_v61 = vand.u32 4294901760, %v206_v58 }
  0x75   : > { %847 = vmatpush.msra.mxu2 %v676_v5  ;;  %888 = vmatpush.msra.mxu3 %v2336_v19  ;;  %v946_v5 = vsub.f32 %v2573_v44, %v945_v6 }
  0x76   : > { %750 = vmatpush.msra.mxu0 %v2443_v53  ;;  %780 = vmatpush.msra.mxu1 %v2336_v19  ;;  %v2607_v19 = vand.u32 4294901760, %v214_v0  ;;  %v2631_v27 = vsub.f32 %v215_v15, %v2596_v16  ;;  %v952_v53 = vsub.f32 %v2586_v45, %v951_v37  ;;  %v963_v60 = vand.u32 4294901760, %v2614_v59 }
  0x77   : > { %851 = vmatpush.msra.mxu2 %v682_v4  ;;  %890 = vmatpush.msra.mxu3 %v2352_v54  ;;  %v211_v4 = vld [vmem:[%s2936_s1 + $0x138] sm:$0xff]  ;;  %v947_v25 = vand.u32 4294901760, %v946_v5  ;;  %v958_v1 = vsub.f32 %v2600_v48, %v957_v40  ;;  %v2758_v5 = vand.u32 4294901760, %v205_v31 }
  0x78   : > { %753 = vmatmul.f32.vlgmr.msra.gmra.mxu0 %v2468_v14  ;;  %782 = vmatpush.msra.mxu1 %v2352_v54  ;;  %v212_v54 = vld [vmem:[%s2936_s1 + $0x140] sm:$0xff]  ;;  %v2662_v9 = vand.u32 4294901760, %v211_v4  ;;  %v953_v26 = vand.u32 4294901760, %v952_v53  ;;  %v964_v28 = vsub.f32 %v2614_v59, %v963_v60  ;;  %v2762_v53 = vsub.f32 %v207_v57, %v2727_v30 }
  0x79   : > { %903 = vmatpush.msrb.mxu0 %v2550_v38  ;;  %855 = vmatpush.msra.mxu2 %v688_v62  ;;  %v2646_v17 = vand.u32 4294901760, %v212_v54  ;;  %v2652_v62 = vsub.f32 %v213_v21, %v2618_v29  ;;  %v959_v49 = vand.u32 4294901760, %v958_v1  ;;  %v2752_v21 = vsub.f32 %v2689_v47, %v2716_v56 }
  0x7a   : > { %892 = vmatpush.msra.mxu3 %v2382_v12  ;;  %784 = vmatpush.msra.mxu1 %v2382_v12  ;;  %v2636_v12 = vsub.f32 %v214_v0, %v2607_v19  ;;  %v965_v63 = vand.u32 4294901760, %v964_v28  ;;  %v1000_v1 = vsub.f32 %v2713_v18, %v999_v34  ;;  %v2779_v28 = vand.u32 4294901760, %v204_v52 }
  0x7b   : > { %905 = vmatpush.msrb.mxu0 %v2560_v42  ;;  %859 = vmatpush.msra.mxu2 %v694_v46  ;;  %v2679_v35 = vsub.f32 %v212_v54, %v2646_v17  ;;  %v981_v39 = vand.u32 4294901760, %v2652_v62  ;;  %v2788_v57 = vsub.f32 %v205_v31, %v2758_v5 }
  0x7c   : > { %894 = vmatpush.msra.mxu3 %v2399_v13  ;;  %861 = vmatmul.f32.vlgmr.msra.gmra.mxu2 %v2449_v20  ;;  %v975_v46 = vand.u32 4294901760, %v2636_v12 }
  0x7d   : > { %907 = vmatpush.msrb.mxu0 %v2570_v22  ;;  %1046 = vmatpush.msrb.mxu2 %v2573_v44  ;;  %v987_v43 = vand.u32 4294901760, %v2679_v35  ;;  %v982_v8 = vsub.f32 %v2652_v62, %v981_v39 }
  0x7e   : > { %786 = vmatpush.msra.mxu1 %v2399_v13  ;;  %896 = vmatpush.msra.mxu3 %v2418_v10  ;;  %v969_v13 = vand.u32 4294901760, %v2631_v27  ;;  %v976_v50 = vsub.f32 %v2636_v12, %v975_v46 }
  0x7f   : > { %898 = vmatmul.f32.vlgmr.msra.gmra.mxu3 %v2449_v20  ;;  %909 = vmatpush.msrb.mxu0 %v2583_v7  ;;  %v209_v20 = vld [vmem:[%s2936_s1 + $0x128] sm:$0xff]  ;;  %v988_v2 = vsub.f32 %v2679_v35, %v987_v43  ;;  %v983_v0 = vand.u32 4294901760, %v982_v8 }
  0x80   : > { %1049 = vmatpush.msrb.mxu2 %v2586_v45  ;;  %1099 = vmatpush.msrb.mxu3 %v2550_v38  ;;  %v970_v41 = vsub.f32 %v2631_v27, %v969_v13  ;;  %v2695_v14 = vand.u32 4294901760, %v209_v20  ;;  %v977_v51 = vand.u32 4294901760, %v976_v50  ;;  %v1017_v50 = vand.u32 4294901760, %v2762_v53 }
  0x81   : > { %788 = vmatpush.msra.mxu1 %v2418_v10  ;;  %911 = vmatpush.msrb.mxu0 %v2596_v16  ;;  %v208_v10 = vld [vmem:[%s2936_s1 + $0x120] sm:$0xff] }
  0x82   : > { %792 = vmatmul.f32.vlgmr.msra.gmra.mxu1 %v595_v3  ;;  %1052 = vmatpush.msrb.mxu2 %v2600_v48  ;;  %v2698_v3 = vsub.f32 %v211_v4, %v2662_v9  ;;  %v2709_v55 = vand.u32 4294901760, %v208_v10  ;;  %v971_v33 = vand.u32 4294901760, %v970_v41  ;;  %v2731_v24 = vsub.f32 %v209_v20, %v2695_v14 }
  0x83   : > { %948 = vmatpush.msrb.mxu1 %v947_v25  ;;  %1101 = vmatpush.msrb.mxu3 %v2560_v42  ;;  %v989_v25 = vand.u32 4294901760, %v988_v2  ;;  %v1018_v2 = vsub.f32 %v2762_v53, %v1017_v50 }
  0x84   : > { %913 = vmatpush.msrb.mxu0 %v2607_v19  ;;  %1055 = vmatpush.msrb.mxu2 %v2614_v59  ;;  %v993_v23 = vand.u32 4294901760, %v2698_v3  ;;  %v2746_v15 = vsub.f32 %v208_v10, %v2709_v55  ;;  %v1005_v4 = vand.u32 4294901760, %v2731_v24  ;;  %v936_v10 = vand.u32 4294901760, %v2752_v21 }
  0x85   : > { %954 = vmatpush.msrb.mxu1 %v953_v26  ;;  %1103 = vmatpush.msrb.mxu3 %v2570_v22  ;;  %v2775_v26 = vsub.f32 %v206_v58, %v2742_v61 }
  0x86   : > { %915 = vmatpush.msrb.mxu0 %v2618_v29  ;;  %1058 = vmatpush.msrb.mxu2 %v2631_v27  ;;  %v994_v54 = vsub.f32 %v2698_v3, %v993_v23  ;;  %v1011_v20 = vand.u32 4294901760, %v2746_v15  ;;  %v1006_v41 = vsub.f32 %v2731_v24, %v1005_v4 }
  0x87   : > { %960 = vmatpush.msrb.mxu1 %v959_v49  ;;  %1105 = vmatpush.msrb.mxu3 %v2583_v7  ;;  %v1023_v58 = vand.u32 4294901760, %v2775_v26 }
  0x88   : > { %917 = vmatpush.msrb.mxu0 %v2646_v17  ;;  %1061 = vmatpush.msrb.mxu2 %v2636_v12  ;;  %v995_v49 = vand.u32 4294901760, %v994_v54  ;;  %v1012_v8 = vsub.f32 %v2746_v15, %v1011_v20  ;;  %v1007_v31 = vand.u32 4294901760, %v1006_v41 }
  0x89   : > { %966 = vmatpush.msrb.mxu1 %v965_v63  ;;  %1107 = vmatpush.msrb.mxu3 %v2596_v16  ;;  %v1001_v63 = vand.u32 4294901760, %v1000_v1 }
  0x8a   : > { %919 = vmatpush.msrb.mxu0 %v2662_v9  ;;  %1064 = vmatpush.msrb.mxu2 %v2652_v62  ;;  %v1013_v54 = vand.u32 4294901760, %v1012_v8 }
  0x8b   : > { %972 = vmatpush.msrb.mxu1 %v971_v33  ;;  %1109 = vmatpush.msrb.mxu3 %v2607_v19  ;;  %v937_v33 = vsub.f32 %v2752_v21, %v936_v10 }
  0x8c   : > { %921 = vmatpush.msrb.mxu0 %v2676_v36  ;;  %1067 = vmatpush.msrb.mxu2 %v2679_v35 }
  0x8d   : > { %978 = vmatpush.msrb.mxu1 %v977_v51  ;;  %1111 = vmatpush.msrb.mxu3 %v2618_v29  ;;  %v2801_v51 = vsub.f32 %v204_v52, %v2779_v28  ;;  %v1024_v52 = vsub.f32 %v2775_v26, %v1023_v58 }
  0x8e   : > { %923 = vmatpush.msrb.mxu0 %v2695_v14  ;;  %1070 = vmatpush.msrb.mxu2 %v2698_v3 }
  0x8f   : > { %984 = vmatpush.msrb.mxu1 %v983_v0  ;;  %1113 = vmatpush.msrb.mxu3 %v2646_v17  ;;  %v1029_v0 = vand.u32 4294901760, %v2788_v57  ;;  %v1035_v1 = vand.u32 4294901760, %v2801_v51 }
  0x90   : > { %925 = vmatpush.msrb.mxu0 %v2709_v55  ;;  %1073 = vmatpush.msrb.mxu2 %v2713_v18 }
  0x91   : > { %990 = vmatpush.msrb.mxu1 %v989_v25  ;;  %1115 = vmatpush.msrb.mxu3 %v2662_v9  ;;  %v938_v25 = vand.u32 4294901760, %v937_v33  ;;  %v1030_v41 = vsub.f32 %v2788_v57, %v1029_v0  ;;  %v1036_v8 = vsub.f32 %v2801_v51, %v1035_v1 }
  0x92   : > { %927 = vmatpush.msrb.mxu0 %v2727_v30  ;;  %1076 = vmatpush.msrb.mxu2 %v2731_v24 }
  0x93   : > { %996 = vmatpush.msrb.mxu1 %v995_v49  ;;  %1117 = vmatpush.msrb.mxu3 %v2676_v36  ;;  %v1019_v49 = vand.u32 4294901760, %v1018_v2  ;;  %v1031_v33 = vand.u32 4294901760, %v1030_v41 }
  0x94   : > { %929 = vmatpush.msrb.mxu0 %v2742_v61  ;;  %1079 = vmatpush.msrb.mxu2 %v2746_v15 }
  0x95   : > { %1002 = vmatpush.msrb.mxu1 %v1001_v63  ;;  %1119 = vmatpush.msrb.mxu3 %v2695_v14  ;;  %v1025_v63 = vand.u32 4294901760, %v1024_v52 }
  0x96   : > { %931 = vmatpush.msrb.mxu0 %v2758_v5  ;;  %1082 = vmatpush.msrb.mxu2 %v2762_v53 }
  0x97   : > { %1008 = vmatpush.msrb.mxu1 %v1007_v31  ;;  %1121 = vmatpush.msrb.mxu3 %v2709_v55 }
  0x98   : > { %933 = vmatpush.msrb.mxu0 %v2779_v28  ;;  %1085 = vmatpush.msrb.mxu2 %v2775_v26 }
  0x99   : > { %1014 = vmatpush.msrb.mxu1 %v1013_v54  ;;  %1123 = vmatpush.msrb.mxu3 %v2727_v30 }
  0x9a   : > { %939 = vmatmul.f32.vlgmr.msrb.gmra.mxu0 %v938_v25  ;;  %1088 = vmatpush.msrb.mxu2 %v2788_v57  ;;  %v1037_v57 = vand.u32 4294901760, %v1036_v8 }
  0x9b   : > { %1140 = vmatpush.msra.mxu0 %v945_v6  ;;  %1020 = vmatpush.msrb.mxu1 %v1019_v49 }
  0x9c   : > { %1125 = vmatpush.msrb.mxu3 %v2742_v61  ;;  %1091 = vmatpush.msrb.mxu2 %v2801_v51 }
  0x9d   : > { %1144 = vmatpush.msra.mxu0 %v951_v37  ;;  %1026 = vmatpush.msrb.mxu1 %v1025_v63  ;;  %v1244_v37 = vld [vmem:[%s2937_s2] sm:$0xff] }
  0x9e   : > { %1127 = vmatpush.msrb.mxu3 %v2758_v5  ;;  %1094 = vmatmul.f32.vlgmr.msrb.gmra.mxu2 %v2752_v21 }
  0x9f   : > { %1148 = vmatpush.msra.mxu0 %v957_v40  ;;  %1032 = vmatpush.msrb.mxu1 %v1031_v33 }
  0xa0   : > { %1129 = vmatpush.msrb.mxu3 %v2779_v28 }
  0xa1   : > { %1133 = vmatmul.f32.vlgmr.msrb.gmra.mxu3 %v936_v10  ;;  %1152 = vmatpush.msra.mxu0 %v963_v60 }
  0xa2   : > { %1038 = vmatpush.msrb.mxu1 %v1037_v57 }
  0xa3   : > { %1040 = vmatmul.f32.vlgmr.msrb.gmra.mxu1 %v2716_v56  ;;  %1156 = vmatpush.msra.mxu0 %v969_v13  ;;  %v1245_v13 = vld [vmem:[%s2937_s2 + $0x8] sm:$0xff] }
  0xa4   : > { %1207 = vmatpush.msra.mxu1 %v2550_v38  ;;  %v1412_v35 = vand.u32 4294901760, %v1245_v13 }
  0xa5   : > { %1160 = vmatpush.msra.mxu0 %v975_v46 }
  0xa6   : > { %1209 = vmatpush.msra.mxu1 %v2560_v42  ;;  %v1439_v3 = vsub.f32 %v1245_v13, %v1412_v35 }
  0xa7   : > { %1164 = vmatpush.msra.mxu0 %v981_v39 }
  0xa8   : > { %1211 = vmatpush.msra.mxu1 %v2570_v22  ;;  %v1440_v52 = vand.u32 4294901760, %v1439_v3 }
  0xa9   : > { %1168 = vmatpush.msra.mxu0 %v987_v43 }
  0xaa   : > { %1213 = vmatpush.msra.mxu1 %v2583_v7  ;;  %v1441_v49 = vsub.f32 %v1439_v3, %v1440_v52 }
  0xab   : > { %1172 = vmatpush.msra.mxu0 %v993_v23 }
  0xac   : > { %1215 = vmatpush.msra.mxu1 %v2596_v16  ;;  %v1442_v8 = vand.u32 4294901760, %v1441_v49 }
  0xad   : > { %1176 = vmatpush.msra.mxu0 %v999_v34 }
  0xae   : > { %1217 = vmatpush.msra.mxu1 %v2607_v19 }
  0xaf   : > { %1180 = vmatpush.msra.mxu0 %v1005_v4 }
  0xb0   : > { %1219 = vmatpush.msra.mxu1 %v2618_v29  ;;  %v1266_v29 = vand.u32 4294901760, %v1244_v37 }
  0xb1   : > { %1184 = vmatpush.msra.mxu0 %v1011_v20 }
  0xb2   : > { %1221 = vmatpush.msra.mxu1 %v2646_v17  ;;  %v2879_v27 = vsub.f32 %v1244_v37, %v1266_v29  ;;  %1267 = vmatpush.msra.mxu2 %v1266_v29 }
  0xb3   : > { %1188 = vmatpush.msra.mxu0 %v1017_v50 }
  0xb4   : > { %1223 = vmatpush.msra.mxu1 %v2662_v9  ;;  %v1294_v17 = vand.u32 4294901760, %v2879_v27  ;;  %1320 = vmatpush.msrb.mxu2 %v2879_v27 }
  0xb5   : > { %1192 = vmatpush.msra.mxu0 %v1023_v58 }
  0xb6   : > { %1225 = vmatpush.msra.mxu1 %v2676_v36  ;;  %v1295_v62 = vsub.f32 %v2879_v27, %v1294_v17 }
  0xb7   : > { %1196 = vmatpush.msra.mxu0 %v1029_v0 }
  0xb8   : > { %1227 = vmatpush.msra.mxu1 %v2695_v14  ;;  %v1296_v36 = vand.u32 4294901760, %v1295_v62 }
  0xb9   : > { %1200 = vmatpush.msra.mxu0 %v1035_v1 }
  0xba   : > { %1229 = vmatpush.msra.mxu1 %v2709_v55  ;;  %1202 = vmatmul.f32.vlgmr.msra.gmra.mxu0 %v2716_v56  ;;  %v1246_v55 = vld [vmem:[%s2937_s2 + $0x10] sm:$0xff] }
  0xbb   : > { %1297 = vmatpush.msra.mxu3 %v1296_v36  ;;  %1466 = vmatpush.msrb.mxu0 %v1439_v3  ;;  %v1558_v18 = vand.u32 4294901760, %v1246_v55 }
  0xbc   : > { %1231 = vmatpush.msra.mxu1 %v2727_v30 }
  0xbd   : > { %1343 = vmatpush.msrb.mxu3 %v1266_v29  ;;  %1559 = vmatpush.msra.mxu0 %v1558_v18  ;;  %v1585_v30 = vsub.f32 %v1246_v55, %v1558_v18 }
  0xbe   : > { %1233 = vmatpush.msra.mxu1 %v2742_v61 }
  0xbf   : > { %v1586_v24 = vand.u32 4294901760, %v1585_v30 }
  0xc0   : > { %1235 = vmatpush.msra.mxu1 %v2758_v5 }
  0xc1   : > { %v1587_v34 = vsub.f32 %v1585_v30, %v1586_v24 }
  0xc2   : > { %1237 = vmatpush.msra.mxu1 %v2779_v28 }
  0xc3   : > { %1239 = vmatmul.f32.vlgmr.msra.gmra.mxu1 %v2716_v56  ;;  %v1588_v5 = vand.u32 4294901760, %v1587_v34 }
  0xc4   : > { %1489 = vmatpush.msrb.mxu1 %v1412_v35 }
  0xc6   : > { %1589 = vmatpush.msra.mxu1 %v1588_v5 }
  0xce   : > { %v258_v42 = vpop.f32.mrf.mxu0 }
  0xd8   : > { %v359_v38 = vpop.f32.mrf.mxu1 }
  0xd9   : > { %v360_v22 = vadd.f32 %v359_v38, %v258_v42 }
  0xda   : > { %v413_v44 = vpop.f32.mrf.mxu2  ;;  %v452_v45 = vpop.f32.mrf.mxu3 }
  0xdb   : > { %v414_v7 = vadd.f32 %v413_v44, %v360_v22 }
  0xdd   : > { %v453_v16 = vadd.f32 %v452_v45, %v414_v7 }
  0xdf   : > { %v521_v6 = vpop.f32.mrf.mxu0 }
  0xe0   : > { %v522_v48 = vadd.f32 %v521_v6, %v453_v16 }
  0xe2   : > { %v558_v19 = vpop.f32.mrf.mxu1 }
  0xe3   : > { %v559_v59 = vadd.f32 %v558_v19, %v522_v48  ;;  %v599_v40 = vpop.f32.mrf.mxu2 }
  0xe5   : > { %v600_v12 = vadd.f32 %v599_v40, %v559_v59 }
  0xe6   : > { %v700_v60 = vpop.f32.mrf.mxu3 }
  0xe7   : > { %v701_v46 = vadd.f32 %v700_v60, %v600_v12 }
  0xf5   : > { %v754_v9 = vpop.f32.mrf.mxu0 }
  0xf6   : > { %v755_v14 = vadd.f32 %v754_v9, %v701_v46 }
  0xff   : > { %v793_v39 = vpop.f32.mrf.mxu1  ;;  %v862_v56 = vpop.f32.mrf.mxu2 }
 0x100   : > { %v794_v43 = vadd.f32 %v793_v39, %v755_v14 }
 0x102   : > { %v863_v23 = vadd.f32 %v862_v56, %v794_v43  ;;  %v899_v61 = vpop.f32.mrf.mxu3 }
 0x104   : > { %v900_v21 = vadd.f32 %v899_v61, %v863_v23 }
 0x117   : > { %v940_v15 = vpop.f32.mrf.mxu0 }
 0x118   : > { %v941_v53 = vadd.f32 %v940_v15, %v900_v21 }
 0x120   : > { %v1041_v4 = vpop.f32.mrf.mxu1 }
 0x121   : > { %v1042_v20 = vadd.f32 %v1041_v4, %v941_v53  ;;  %v1095_v26 = vpop.f32.mrf.mxu2 }
 0x123   : > { %v1096_v28 = vadd.f32 %v1095_v26, %v1042_v20 }
 0x124   : > { %v1134_v10 = vpop.f32.mrf.mxu3 }
 0x125   : > { %v1135_v58 = vadd.f32 %v1134_v10, %v1096_v28 }
 0x137   : > { %v1203_v50 = vpop.f32.mrf.mxu0 }
 0x138   : > { %v1204_v51 = vadd.f32 %v1203_v50, %v1135_v58 }
 0x140   : > { %v1240_v31 = vpop.f32.mrf.mxu1 }
 0x141   : > { %v1241_v2 = vadd.f32 %v1240_v31, %v1204_v51 }
 0x143   : > { %v1243_v0 = vmax.f32 %v1241_v2, 0.0 }
 0x145   : > { %v1249_v54 = vsel %vm1247_vm0, %v1243_v0, 0 }
 0x146   : > { %v1268_v25 = vand.u32 4294901760, %v1249_v54 }
 0x148   : > { %v1269_v1 = vsub.f32 %v1249_v54, %v1268_v25  ;;  %1299 = vmatmul.f32.vlgmr.msra.gmra.mxu3 %v1268_v25 }
 0x149   : > { %1391 = vmatpush.msra.mxu3 %v1266_v29 }
 0x14a   : > { %1469 = vmatmul.f32.vlgmr.msrb.gmra.mxu0 %v1269_v1  ;;  %v1270_v41 = vand.u32 4294901760, %v1269_v1 }
 0x14b   : > { %1661 = vmatpush.msrb.mxu0 %v1586_v24 }
 0x14c   : > { %1493 = vmatmul.f32.vlgmr.msrb.gmra.mxu1 %v1270_v41  ;;  %v1271_v63 = vsub.f32 %v1269_v1, %v1270_v41 }
 0x14d   : > { %1683 = vmatpush.msrb.mxu1 %v1558_v18 }
 0x14e   : > { %v1272_v33 = vand.u32 4294901760, %v1271_v63 }
 0x150   : > { %1273 = vmatmul.f32.vlgmr.msra.gmra.mxu2 %v1272_v33  ;;  %1347 = vmatmul.f32.vlgmr.msrb.gmra.mxu3 %v1270_v41 }
 0x151   : > { %1369 = vmatpush.msra.mxu2 %v1294_v17  ;;  %1443 = vmatpush.msrb.mxu3 %v1442_v8 }
 0x152   : > { %1565 = vmatmul.f32.vlgmr.msra.gmra.mxu0 %v1272_v33 }
 0x154   : > { %1591 = vmatmul.f32.vlgmr.msra.gmra.mxu1 %v1268_v25 }
 0x158   : > { %1323 = vmatmul.f32.vlgmr.msrb.gmra.mxu2 %v1269_v1  ;;  %1393 = vmatmul.f32.vlgmr.msra.gmra.mxu3 %v1268_v25 }
 0x159   : > { %1413 = vmatpush.msrb.mxu2 %v1412_v35  ;;  %1537 = vmatpush.msra.mxu3 %v1412_v35 }
 0x15a   : > { %1663 = vmatmul.f32.vlgmr.msrb.gmra.mxu0 %v1268_v25 }
 0x15c   : > { %1685 = vmatmul.f32.vlgmr.msrb.gmra.mxu1 %v1268_v25 }
 0x160   : > { %1371 = vmatmul.f32.vlgmr.msra.gmra.mxu2 %v1268_v25  ;;  %1445 = vmatmul.f32.vlgmr.msrb.gmra.mxu3 %v1268_v25 }
 0x161   : > { %1515 = vmatpush.msra.mxu2 %v1440_v52  ;;  %1635 = vmatpush.msrb.mxu3 %v1558_v18 }
 0x168   : > { %1419 = vmatmul.f32.vlgmr.msrb.gmra.mxu2 %v1272_v33  ;;  %1539 = vmatmul.f32.vlgmr.msra.gmra.mxu3 %v1268_v25 }
 0x169   : > { %1612 = vmatpush.msrb.mxu2 %v1585_v30 }
 0x170   : > { %1517 = vmatmul.f32.vlgmr.msra.gmra.mxu2 %v1268_v25  ;;  %1639 = vmatmul.f32.vlgmr.msrb.gmra.mxu3 %v1270_v41 }
 0x178   : > { %1615 = vmatmul.f32.vlgmr.msrb.gmra.mxu2 %v1269_v1 }
 0x1c7   : > { %v1470_v40 = vpop.f32.mrf.mxu0 }
 0x1c9   : > { %v1494_v17 = vpop.f32.mrf.mxu1 }
 0x1cb   : > { %v1300_v57 = vpop.f32.mrf.mxu3 }
 0x1cf   : > { %v1566_v36 = vpop.f32.mrf.mxu0 }
 0x1d1   : > { %v1592_v39 = vpop.f32.mrf.mxu1 }
 0x1d2   : > { %v1593_v14 = vadd.f32 %v1592_v39, %v1566_v36 }
 0x1d3   : > { %v1274_v38 = vpop.f32.mrf.mxu2  ;;  %v1348_v42 = vpop.f32.mrf.mxu3 }
 0x1d4   : > { %v1301_v44 = vadd.f32 %v1300_v57, %v1274_v38 }
 0x1d7   : > { %v1664_v30 = vpop.f32.mrf.mxu0 }
 0x1d9   : > { %v1686_v24 = vpop.f32.mrf.mxu1 }
 0x1db   : > { %v1324_v22 = vpop.f32.mrf.mxu2  ;;  %v1394_v45 = vpop.f32.mrf.mxu3 }
 0x1dc   : > { %v1325_v7 = vadd.f32 %v1324_v22, %v1301_v44 }
 0x1de   : > { %v1349_v16 = vadd.f32 %v1348_v42, %v1325_v7 }
 0x1e3   : > { %v1372_v6 = vpop.f32.mrf.mxu2  ;;  %v1446_v59 = vpop.f32.mrf.mxu3 }
 0x1e4   : > { %v1373_v48 = vadd.f32 %v1372_v6, %v1349_v16 }
 0x1e6   : > { %v1395_v19 = vadd.f32 %v1394_v45, %v1373_v48 }
 0x1e8   : > { %v1689_v37 = vmax.f32 %v1395_v19, 0.0 }
 0x1ea   : > { %v1692_v29 = vmul.f32 %v1689_v37, %v2345_v32 }
 0x1eb   : > { %v1420_v27 = vpop.f32.mrf.mxu2  ;;  %v1540_v9 = vpop.f32.mrf.mxu3 }
 0x1ec   : > { %1695 = vst [vmem:[%s2894_s26] sm:$0xff] %v1692_v29  ;;  %v1447_v12 = vadd.f32 %v1446_v59, %v1420_v27 }
 0x1ee   : > { %v1471_v60 = vadd.f32 %v1470_v40, %v1447_v12 }
 0x1f0   : > { %v1495_v62 = vadd.f32 %v1494_v17, %v1471_v60 }
 0x1f3   : > { %v1518_v13 = vpop.f32.mrf.mxu2  ;;  %v1640_v18 = vpop.f32.mrf.mxu3 }
 0x1f4   : > { %v1519_v46 = vadd.f32 %v1518_v13, %v1495_v62 }
 0x1f6   : > { %v1541_v35 = vadd.f32 %v1540_v9, %v1519_v46 }
 0x1f8   : > { %v1690_v32 = vmax.f32 %v1541_v35, 0.0 }
 0x1fa   : > { %v1693_v3 = vmul.f32 %v1690_v32, %v2432_v11 }
 0x1fb   : > { %v1616_v55 = vpop.f32.mrf.mxu2 }
 0x1fc   : > { %1696 = vst [vmem:[%s2894_s26 + $0x8] sm:$0xff] %v1693_v3  ;;  %v1617_v43 = vadd.f32 %v1616_v55, %v1593_v14 }
 0x1fe   : > { %v1641_v56 = vadd.f32 %v1640_v18, %v1617_v43 }
 0x200   : > { %v1665_v23 = vadd.f32 %v1664_v30, %v1641_v56 }
 0x202   : > { %v1687_v61 = vadd.f32 %v1686_v24, %v1665_v23 }
 0x204   : > { %v1691_v11 = vmax.f32 %v1687_v61, 0.0 }
 0x206   : > { %v1694_v34 = vmul.f32 %v1691_v11, %v2689_v47 }
 0x208   : > { %1697 = vst [vmem:[%s2894_s26 + $0x10] sm:$0xff] %v1694_v34 }
 0x209   : > { %1851 = shalt.err (!%p1848_p3)
}
 0x20a   : > { %1785 = dma.vmem_to_hbm [thread:$0]  (%p1946_p5), %s1713_s4, 384, %s1715_s5, %s1699_s16  }
 0x20b PF: > { %p1791_p4 = scmp.ge.s32.totalorder %s1886_s15, 2  ;;  %s1726_s19 = sand.u32 1, %s1874_s12  }
 0x20c   : > { %s1727_s20 = scalar_lea.sflag [#allocation3], %s1726_s19 }
 0x20d   : > { %p1788_p7 = pnand %p1791_p4, %p1950_p6 }
 0x20f   : > { %p1789_p8 = pneg %p1788_p7 }
 0x211   : > { %1869 = dma.done.wait (%p1789_p8), %s1727_s20, 384  }
 0x212   : > { %1871 = vsyncadd (%p1789_p8), %s1727_s20, 4294966912  ;;  %p13_p9 = scmp.ge.s32.totalorder %s1933_s18, 6   ;;  %s2997_s12 = smov %s1878_s13 }
 0x213   : > { %s2998_s13 = smov %s1882_s14  ;;  %s2999_s14 = smov %s1944_s21 }
 0x214   : > { %s3000_s15 = smov %s1933_s18  ;;  %15 = sbr.rel (!%p13_p9) target bundleno = 3 (0x3), region = 67 }
 0x219   :  { %1733 = vsyncpa [#allocation3], 1 }
 0x21a   :  { %1735 = vsyncpa [#allocation3 + $0x1], 1 }

</bundles_post_ra>
